<compile_context>
chip_gen: v7x
topology: tpu7x:2x2x1
jax: 0.10.0
libtpu: 0.0.40
codegen_flags: <defaults>
</compile_context>

<pallas_src>
import functools

import jax
import jax.numpy as jnp
from jax import lax
from jax.experimental import pallas as pl
from jax.experimental.pallas import tpu as pltpu

LANES = 128
SUBLANES = 8
TARGET_BLOCK_BYTES = 4 << 20          # ~4 MiB per input block
VMEM_LIMIT_BYTES = 32 * 1024 * 1024   # 2 inputs x 2 bufs x 4 MiB = 16 MiB + headroom


def _wbce_kernel(yt_ref, yp_ref, out_ref, *, alpha, rows, tile_rows,
                 blocks_per_split, need_mask, binary_targets):
    c = pl.program_id(0)   # core / split index ("parallel")
    i = pl.program_id(1)   # row-block index within the split ("arbitrary")

    @pl.when(i == 0)
    def _init():
        out_ref[...] = jnp.zeros_like(out_ref)

    yt = yt_ref[...].astype(jnp.float32)
    yp = yp_ref[...].astype(jnp.float32)

    # weight z = 1 + alpha * y_true ; PyTorch BCELoss clamps log terms at -100
    w = 1.0 + alpha * yt
    if binary_targets:
        # Single-log fast path, valid when y_true is exactly {0, 1}.
        p_sel = jnp.where(yt >= 0.5, yp, 1.0 - yp)
        loss = -w * jnp.maximum(jnp.log(p_sel), -100.0)
    else:
        log_p = jnp.maximum(jnp.log(yp), -100.0)
        log_1mp = jnp.maximum(jnp.log1p(-yp), -100.0)
        loss = -w * (yt * log_p + (1.0 - yt) * log_1mp)

    def _accumulate(vals):
        # Fold the tile into a vreg-shaped (8,128) partial sum: pure VPU adds.
        out_ref[...] += jnp.sum(
            vals.reshape(tile_rows // SUBLANES, SUBLANES, LANES), axis=0)[None]

    if need_mask:
        gb = c * blocks_per_split + i            # unclamped global block id
        rows_remaining = rows - gb * tile_rows   # scalar (may be <= 0)

        @pl.when(rows_remaining >= tile_rows)    # interior blocks: no mask work
        def _full():
            _accumulate(loss)

        @pl.when(rows_remaining < tile_rows)     # partial / duplicated last block
        def _partial():
            local_rows = lax.broadcasted_iota(jnp.int32, (tile_rows, LANES), 0)
            _accumulate(jnp.where(local_rows < rows_remaining, loss, 0.0))
    else:
        _accumulate(loss)


def _main_sum(yt_flat, yp_flat, alpha, binary_targets, max_tile_rows):
    """Sum of per-element weighted BCE over a 1024-aligned flat prefix."""
    n_main = yt_flat.size
    rows = n_main // LANES                       # multiple of 8 by construction
    yt2 = yt_flat.reshape(rows, LANES)
    yp2 = yp_flat.reshape(rows, LANES)

    itemsize = max(yt_flat.dtype.itemsize, yp_flat.dtype.itemsize)
    cap = max(SUBLANES,
              (TARGET_BLOCK_BYTES // (LANES * itemsize)) // SUBLANES * SUBLANES)
    tile_rows = min(cap, rows)
    if max_tile_rows is not None:                # test hook / manual override
        tile_rows = min(tile_rows,
                        max(SUBLANES, (max_tile_rows // SUBLANES) * SUBLANES))

    num_blocks = pl.cdiv(rows, tile_rows)
    num_splits = 2 if num_blocks >= 2 else 1     # 2-TC shard on v7x / megacore
    blocks_per_split = pl.cdiv(num_blocks, num_splits)
    # Mask only needed if the (split x block) grid over-covers the real rows.
    need_mask = (num_splits * blocks_per_split * tile_rows) != rows

    def in_map(c, i):
        # Clamp so duplicated trailing slots re-read the last real block
        # (their contribution is masked to zero inside the kernel).
        return (jnp.minimum(c * blocks_per_split + i, num_blocks - 1), 0)

    kernel = functools.partial(
        _wbce_kernel, alpha=float(alpha), rows=rows, tile_rows=tile_rows,
        blocks_per_split=blocks_per_split, need_mask=need_mask,
        binary_targets=binary_targets)

    partials = pl.pallas_call(
        kernel,
        out_shape=jax.ShapeDtypeStruct((num_splits, SUBLANES, LANES),
                                       jnp.float32),
        grid_spec=pltpu.PrefetchScalarGridSpec(
            num_scalar_prefetch=0,
            grid=(num_splits, blocks_per_split),
            in_specs=[
                pl.BlockSpec((tile_rows, LANES), in_map),
                pl.BlockSpec((tile_rows, LANES), in_map),
            ],
            out_specs=pl.BlockSpec((1, SUBLANES, LANES), lambda c, i: (c, 0, 0)),
        ),
        compiler_params=pltpu.CompilerParams(
            dimension_semantics=("parallel", "arbitrary"),
            vmem_limit_bytes=VMEM_LIMIT_BYTES),
    )(yt2, yp2)
    # Tiny final reduce (num_splits * 1024 f32) done by XLA in the wrapper.
    return jnp.sum(partials)


def _tail_sum(yt_tail, yp_tail, alpha):
    """Plain-jnp sum for the <=1023-element unaligned tail."""
    yt = yt_tail.astype(jnp.float32)
    yp = yp_tail.astype(jnp.float32)
    w = 1.0 + alpha * yt
    log_p = jnp.maximum(jnp.log(yp), -100.0)
    log_1mp = jnp.maximum(jnp.log1p(-yp), -100.0)
    return jnp.sum(-w * (yt * log_p + (1.0 - yt) * log_1mp))


def structural_loss(y_true, y_pred, alpha, *, assume_binary_targets=False,
                    max_tile_rows=None):
    assert y_true.shape == y_pred.shape
    n = int(y_true.size)
    assert n > 0

    yt = y_true.reshape(-1)
    yp = y_pred.reshape(-1)

    chunk = SUBLANES * LANES                     # 1024
    n_main = (n // chunk) * chunk

    total = jnp.zeros((), jnp.float32)
    if n_main:
        if n_main == n:
            yt_main, yp_main = yt, yp            # zero-copy reshape path
        else:
            yt_main, yp_main = yt[:n_main], yp[:n_main]
        total = total + _main_sum(yt_main, yp_main, float(alpha),
                                  assume_binary_targets, max_tile_rows)
    if n_main < n:
        total = total + _tail_sum(yt[n_main:], yp[n_main:], float(alpha))
    return total / n


def _reference(y_true, y_pred, alpha):
    yt = y_true.astype(jnp.float32)
    yp = y_pred.astype(jnp.float32)
    w = 1.0 + alpha * yt
    log_p = jnp.maximum(jnp.log(yp), -100.0)
    log_1mp = jnp.maximum(jnp.log1p(-yp), -100.0)
    return jnp.mean(-w * (yt * log_p + (1.0 - yt) * log_1mp))


if __name__ == "__main__":
    key = jax.random.PRNGKey(0)
    k1, k2, k3, k4, k5, k6 = jax.random.split(key, 6)
    alpha = 2.0

    # Main case: [B, C, H, W] = [2, 4, 16, 16] (2048 elems, fully aligned).
    y_true = (jax.random.uniform(k1, (2, 4, 16, 16)) > 0.5).astype(jnp.float32)
    y_pred = jax.random.uniform(k2, (2, 4, 16, 16), minval=1e-4, maxval=1.0 - 1e-4)
    out = jax.block_until_ready(structural_loss(y_true, y_pred, alpha))
    ref = _reference(y_true, y_pred, alpha)
    assert jnp.allclose(out, ref, rtol=1e-5, atol=1e-6), (out, ref)

    # Opt-in binary-target (single-log) fast path agrees on {0,1} targets.
    out_b = jax.block_until_ready(
        structural_loss(y_true, y_pred, alpha, assume_binary_targets=True))
    assert jnp.allclose(out_b, ref, rtol=1e-5, atol=1e-6), (out_b, ref)

    # Multi-block + 2-way split + partial-last-block mask path (small tiles
    # forced via max_tile_rows purely for test coverage): 3072 elems, 24 rows.
    y_true3 = (jax.random.uniform(k3, (2, 4, 24, 16)) > 0.5).astype(jnp.float32)
    y_pred3 = jax.random.uniform(k4, (2, 4, 24, 16), minval=1e-4, maxval=1.0 - 1e-4)
    ref3 = _reference(y_true3, y_pred3, alpha)
    out3a = jax.block_until_ready(
        structural_loss(y_true3, y_pred3, alpha, max_tile_rows=16))  # partial block
    assert jnp.allclose(out3a, ref3, rtol=1e-5, atol=1e-6), (out3a, ref3)
    out3b = jax.block_until_ready(
        structural_loss(y_true3, y_pred3, alpha, max_tile_rows=8))   # clamped dup block
    assert jnp.allclose(out3b, ref3, rtol=1e-5, atol=1e-6), (out3b, ref3)

    # Misaligned small tensor: exercises the aligned-prefix + wrapper-tail path.
    y_true2 = (jax.random.uniform(k5, (2, 3, 7, 5)) > 0.5).astype(jnp.float32)
    y_pred2 = jax.random.uniform(k6, (2, 3, 7, 5), minval=1e-4, maxval=1.0 - 1e-4)
    out2 = jax.block_until_ready(structural_loss(y_true2, y_pred2, alpha))
    ref2 = _reference(y_true2, y_pred2, alpha)
    assert jnp.allclose(out2, ref2, rtol=1e-5, atol=1e-6), (out2, ref2)

    print("KERNEL_OK")
</pallas_src>

<mosaic_0001>
module attributes {stable_mosaic.version = 11 : i64} {
  func.func @_wbce_kernel(%arg0: i32, %arg1: i32, %arg2: memref<16x128xf32, #tpu.memory_space<vmem>>, %arg3: memref<16x128xf32, #tpu.memory_space<vmem>>, %arg4: memref<1x8x128xf32, #tpu.memory_space<vmem>>) attributes {dimension_semantics = [#tpu.dimension_semantics<parallel>, #tpu.dimension_semantics<arbitrary>], iteration_bounds = array<i64: 1, 1>, scalar_prefetch = 0 : i64, scratch_operands = 0 : i64, tpu.core_type = #tpu.core_type<tc>, window_params = [{transform_indices = @transform_0, window_bounds = array<i64: 16, 128>}, {transform_indices = @transform_1, window_bounds = array<i64: 16, 128>}, {transform_indices = @transform_2, window_bounds = array<i64: 1, 8, 128>}]} {
    %c0_i32 = arith.constant 0 : i32
    %0 = arith.cmpi eq, %arg1, %c0_i32 : i32
    %1 = arith.extui %0 : i1 to i32
    %c0_i32_0 = arith.constant 0 : i32
    %2 = arith.cmpi ne, %1, %c0_i32_0 : i32
    scf.if %2 {
      %cst_17 = arith.constant 0.000000e+00 : f32
      %31 = vector.broadcast %cst_17 : f32 to vector<1x8x128xf32>
      %c0_18 = arith.constant 0 : index
      %c0_19 = arith.constant 0 : index
      %c0_20 = arith.constant 0 : index
      %32 = vector.load %arg4[%c0_18, %c0_19, %c0_20] : memref<1x8x128xf32, #tpu.memory_space<vmem>>, vector<1x8x128xf32>
      tpu.vector_store %arg4[%c0_18, %c0_19, %c0_20], %31 {strides = array<i32>} : memref<1x8x128xf32, #tpu.memory_space<vmem>>, vector<1x8x128xf32>,
    } else {
    }
    %c0 = arith.constant 0 : index
    %c0_1 = arith.constant 0 : index
    %3 = vector.load %arg2[%c0, %c0_1] : memref<16x128xf32, #tpu.memory_space<vmem>>, vector<16x128xf32>
    %c0_2 = arith.constant 0 : index
    %c0_3 = arith.constant 0 : index
    %4 = vector.load %arg3[%c0_2, %c0_3] : memref<16x128xf32, #tpu.memory_space<vmem>>, vector<16x128xf32>
    %cst = arith.constant 2.000000e+00 : f32
    %5 = vector.broadcast %cst : f32 to vector<16x128xf32>
    %6 = arith.mulf %5, %3 : vector<16x128xf32>
    %cst_4 = arith.constant 1.000000e+00 : f32
    %7 = vector.broadcast %cst_4 : f32 to vector<16x128xf32>
    %8 = arith.addf %7, %6 : vector<16x128xf32>
    %9 = math.log %4 : vector<16x128xf32>
    %cst_5 = arith.constant -1.000000e+02 : f32
    %10 = vector.broadcast %cst_5 : f32 to vector<16x128xf32>
    %11 = arith.maximumf %9, %10 : vector<16x128xf32>
    %cst_6 = arith.constant 0.000000e+00 : f32
    %12 = vector.broadcast %cst_6 : f32 to vector<16x128xf32>
    %13 = arith.subf %12, %4 : vector<16x128xf32>
    %14 = math.log1p %13 : vector<16x128xf32>
    %cst_7 = arith.constant -1.000000e+02 : f32
    %15 = vector.broadcast %cst_7 : f32 to vector<16x128xf32>
    %16 = arith.maximumf %14, %15 : vector<16x128xf32>
    %cst_8 = arith.constant 0.000000e+00 : f32
    %17 = vector.broadcast %cst_8 : f32 to vector<16x128xf32>
    %18 = arith.subf %17, %8 : vector<16x128xf32>
    %19 = arith.mulf %3, %11 : vector<16x128xf32>
    %cst_9 = arith.constant 1.000000e+00 : f32
    %20 = vector.broadcast %cst_9 : f32 to vector<16x128xf32>
    %21 = arith.subf %20, %3 : vector<16x128xf32>
    %22 = arith.mulf %21, %16 : vector<16x128xf32>
    %23 = arith.addf %19, %22 : vector<16x128xf32>
    %24 = arith.mulf %18, %23 : vector<16x128xf32>
    %c0_10 = arith.constant 0 : index
    %c0_11 = arith.constant 0 : index
    %c0_12 = arith.constant 0 : index
    %25 = vector.load %arg4[%c0_10, %c0_11, %c0_12] : memref<1x8x128xf32, #tpu.memory_space<vmem>>, vector<1x8x128xf32>
    %26 = vector.shape_cast %24 : vector<16x128xf32> to vector<2x8x128xf32>
    %cst_13 = arith.constant dense<0.000000e+00> : vector<8x128xf32>
    %27 = vector.multi_reduction <add>, %26, %cst_13 [0] : vector<2x8x128xf32> to vector<8x128xf32>
    %28 = vector.shape_cast %27 : vector<8x128xf32> to vector<1x8x128xf32>
    %29 = arith.addf %25, %28 : vector<1x8x128xf32>
    %c0_14 = arith.constant 0 : index
    %c0_15 = arith.constant 0 : index
    %c0_16 = arith.constant 0 : index
    %30 = vector.load %arg4[%c0_14, %c0_15, %c0_16] : memref<1x8x128xf32, #tpu.memory_space<vmem>>, vector<1x8x128xf32>
    tpu.vector_store %arg4[%c0_14, %c0_15, %c0_16], %29 {strides = array<i32>} : memref<1x8x128xf32, #tpu.memory_space<vmem>>, vector<1x8x128xf32>,
    return
  }
  func.func @transform_0(%arg0: i32, %arg1: i32) -> (i32, i32) {
    %c1_i32 = arith.constant 1 : i32
    %0 = arith.muli %arg0, %c1_i32 : i32
    %1 = arith.addi %0, %arg1 : i32
    %c0_i32 = arith.constant 0 : i32
    %2 = arith.minsi %1, %c0_i32 : i32
    %c0_i32_0 = arith.constant 0 : i32
    %c0_i32_1 = arith.constant 0 : i32
    return %2, %c0_i32_0 : i32, i32
  }
  func.func @transform_1(%arg0: i32, %arg1: i32) -> (i32, i32) {
    %c1_i32 = arith.constant 1 : i32
    %0 = arith.muli %arg0, %c1_i32 : i32
    %1 = arith.addi %0, %arg1 : i32
    %c0_i32 = arith.constant 0 : i32
    %2 = arith.minsi %1, %c0_i32 : i32
    %c0_i32_0 = arith.constant 0 : i32
    %c0_i32_1 = arith.constant 0 : i32
    return %2, %c0_i32_0 : i32, i32
  }
  func.func @transform_2(%arg0: i32, %arg1: i32) -> (i32, i32, i32) {
    %c0_i32 = arith.constant 0 : i32
    %c0_i32_0 = arith.constant 0 : i32
    %c0_i32_1 = arith.constant 0 : i32
    return %arg0, %c0_i32, %c0_i32_0 : i32, i32, i32
  }
}

</mosaic_0001>

<bundles_post_ra>
// kernel: tpu_custom_call.1
= control target key start
LH: loop header
LB: loop body
LE: loop exit
PB: predicated region body
PF: predicated region fallthrough
CT: control target
= control target key end

     0   :  { %7 = vsyncpa [#allocation3], 0  ;;  %s279_s0 = inlined_call_operand.hbm [shape: f32[16,128], index: 0, kind: input, shape index: {}]   ;;  %s280_s1 = inlined_call_operand.hbm [shape: f32[16,128], index: 1, kind: input, shape index: {}]   ;;  %s281_s2 = inlined_call_operand.hbm [shape: f32[1,8,128], index: 2, kind: output, shape index: {}]  }
   0x1   :  { %8 = vsyncpa [#allocation6], 0 }
   0x2   :  { %9 = vsyncpa [#allocation4], 0  ;;  %s223_s9 = smov [#allocation2]   ;;  %s151_s13 = scalar_lea.hbm %s279_s0, 256 }
   0x3   :  { %s21_s10 = sshll.u32 %s223_s9, 4  ;;  %p152_p0 = scmp.ne.s32.totalorder %s279_s0, %s151_s13  ;;  %s22_s10 = int_to_ptr.vmem [resolvable:$true] %s21_s10 }
   0x4   :  { %p155_p1 = scmp.lt.u32.totalorder %s151_s13, %s279_s0 }
   0x6   :  { %p157_p2 = pnand %p155_p1, %p152_p0 }
   0x8   :  { %160 = shalt.err (!%p157_p2)
}
   0x9   :  { %s161_s18 = scalar_lea.vmem %s22_s10, 256  ;;  %p166_p4 = scmp.lt.s32.totalorder %s22_s10, %s22_s10 }
   0xa   :  { %p162_p3 = scmp.ne.s32.totalorder %s22_s10, %s161_s18  ;;  %p167_p5 = scmp.lt.s32.totalorder %s161_s18, %s161_s18 }
   0xc   :  { %p168_p6 = por %p167_p5, %p166_p4 }
   0xe   :  { %p169_p7 = pnand %p168_p6, %p162_p3 }
  0x10   :  { %172 = shalt.err (!%p169_p7)
}
  0x11   :  { %s224_s19 = smov 128   ;;  %s225_s20 = smov 8  }
  0x12   :  { %27 = dma.hbm_to_vmem [thread:$0]  %s279_s0, 256, %s22_s10, [#allocation3], %s224_s19, %s224_s19, %s225_s20  }
  0x13   :  { %s226_s23 = smov [#allocation5]   ;;  %s173_s27 = scalar_lea.hbm %s280_s1, 256 }
  0x14   :  { %s39_s24 = sshll.u32 %s226_s23, 4  ;;  %p174_p8 = scmp.ne.s32.totalorder %s280_s1, %s173_s27  ;;  %s40_s24 = int_to_ptr.vmem [resolvable:$true] %s39_s24 }
  0x15   :  { %p177_p9 = scmp.lt.u32.totalorder %s173_s27, %s280_s1 }
  0x17   :  { %p179_p10 = pnand %p177_p9, %p174_p8 }
  0x19   :  { %182 = shalt.err (!%p179_p10)
}
  0x1a   :  { %s183_s4 = scalar_lea.vmem %s40_s24, 256  ;;  %p188_p12 = scmp.lt.s32.totalorder %s40_s24, %s40_s24 }
  0x1b   :  { %p184_p11 = scmp.ne.s32.totalorder %s40_s24, %s183_s4  ;;  %p189_p13 = scmp.lt.s32.totalorder %s183_s4, %s183_s4 }
  0x1d   :  { %p190_p0 = por %p189_p13, %p188_p12 }
  0x1f   :  { %p191_p1 = pnand %p190_p0, %p184_p11 }
  0x21   :  { %194 = shalt.err (!%p191_p1)
}
  0x22   :  { %45 = dma.hbm_to_vmem [thread:$0]  %s280_s1, 256, %s40_s24, [#allocation6], %s224_s19, %s224_s19, %s225_s20  }
  0x23   :  { %217 = dma.done.wait [#allocation3], 256  }
  0x24   :  { %218 = vsyncadd [#allocation3], 4294967040 }
  0x25   :  { %219 = dma.done.wait [#allocation6], 256  }
  0x26   :  { %220 = vsyncadd [#allocation6], 4294967040  ;;  %v67_v0 = vld [vmem:[#allocation5] sm:$0xff]  ;;  %v68_v1 = vld [vmem:[#allocation5 + $0x8] sm:$0xff]  ;;  %s227_s1 = smov [#allocation7]  }
  0x27   :  { %143 = vlog2.f32 %v67_v0  ;;  %v79_v2 = vsub.f32 0.0, %v67_v0  ;;  %v80_v3 = vsub.f32 0.0, %v68_v1  ;;  %v65_v8 = vld [vmem:[#allocation2] sm:$0xff]  ;;  %v66_v11 = vld [vmem:[#allocation2 + $0x8] sm:$0xff]  ;;  %s123_s6 = sshll.u32 %s227_s1, 4  ;;  %s124_s6 = int_to_ptr.vmem [resolvable:$true] %s123_s6 }
  0x28   :  { %145 = vlog2.f32 %v68_v1  ;;  %v69_v17 = vmul.f32 2.0, %v65_v8  ;;  %v70_v19 = vmul.f32 2.0, %v66_v11  ;;  %v105_v29 = vsub.f32 1.0, %v65_v8  ;;  %s195_s7 = scalar_lea.vmem %s124_s6, 128  ;;  %p200_p3 = scmp.lt.s32.totalorder %s124_s6, %s124_s6 }
  0x29   :  { %v81_v4 = vadd.f32 1.0, %v79_v2  ;;  %v90_v5 = vadd.f32 1.0, %v80_v3  ;;  %v84_v6 = vmul.f32 -0.5, %v79_v2  ;;  %v93_v7 = vmul.f32 -0.5, %v80_v3  ;;  %p196_p2 = scmp.ne.s32.totalorder %s124_s6, %s195_s7  ;;  %p201_p4 = scmp.lt.s32.totalorder %s195_s7, %s195_s7 }
  0x2a   :  { %v87_v12 = vand.u32 2147483647, %v79_v2  ;;  %v96_v16 = vand.u32 2147483647, %v80_v3  ;;  %v71_v27 = vadd.f32 1.0, %v69_v17  ;;  %v72_v30 = vadd.f32 1.0, %v70_v19 }
  0x2b   :  { %147 = vlog2.f32 %v81_v4  ;;  %v85_v9 = vadd.f32 1.0, %v84_v6  ;;  %v94_v13 = vadd.f32 1.0, %v93_v7  ;;  %v106_v32 = vsub.f32 1.0, %v66_v11  ;;  %p202_p5 = por %p201_p4, %p200_p3 }
  0x2c   :  { %149 = vlog2.f32 %v90_v5  ;;  %vm88_vm0 = vcmp.lt.f32.partialorder %v87_v12, 0.0004427343  ;;  %vm97_vm1 = vcmp.lt.f32.partialorder %v96_v16, 0.0004427343  ;;  %v101_v38 = vsub.f32 0.0, %v71_v27 }
  0x2d   :  { %v86_v20 = vmul.f32 %v85_v9, %v79_v2  ;;  %v95_v23 = vmul.f32 %v94_v13, %v80_v3  ;;  %v102_v40 = vsub.f32 0.0, %v72_v30  ;;  %p203_p6 = pnand %p202_p5, %p196_p2 }
  0x31   :  { %v144_v10 = vpop.eup %143 }
  0x32   :  { %v146_v14 = vpop.eup %145  ;;  %v74_v15 = vmul.f32 0.6931472, %v144_v10 }
  0x33   :  { %v76_v18 = vmul.f32 0.6931472, %v146_v14 }
  0x34   :  { %v77_v22 = vmax.f32 %v74_v15, -100.0 }
  0x35   :  { %v148_v21 = vpop.eup %147  ;;  %v78_v25 = vmax.f32 %v76_v18, -100.0 }
  0x36   :  { %v150_v24 = vpop.eup %149  ;;  %v83_v26 = vmul.f32 0.6931472, %v148_v21  ;;  %v103_v35 = vmul.f32 %v77_v22, %v65_v8 }
  0x37   :  { %v92_v28 = vmul.f32 0.6931472, %v150_v24  ;;  %v104_v37 = vmul.f32 %v78_v25, %v66_v11 }
  0x38   :  { %v89_v31 = vsel %vm88_vm0, %v86_v20, %v83_v26 }
  0x39   :  { %v98_v33 = vsel %vm97_vm1, %v95_v23, %v92_v28  ;;  %v99_v34 = vmax.f32 %v89_v31, -100.0 }
  0x3a   :  { %v100_v36 = vmax.f32 %v98_v33, -100.0 }
  0x3b   :  { %v107_v39 = vmul.f32 %v105_v29, %v99_v34 }
  0x3c   :  { %v108_v41 = vmul.f32 %v106_v32, %v100_v36 }
  0x3d   :  { %v109_v42 = vadd.f32 %v107_v39, %v103_v35 }
  0x3e   :  { %v110_v43 = vadd.f32 %v108_v41, %v104_v37 }
  0x3f   :  { %v111_v44 = vmul.f32 %v109_v42, %v101_v38 }
  0x40   :  { %v112_v45 = vmul.f32 %v110_v43, %v102_v40 }
  0x42   :  { %v114_v46 = vadd.f32 %v112_v45, %v111_v44 }
  0x44   :  { %116 = vst [vmem:[#allocation7] sm:$0xff] %v114_v46 }
  0x45   :  { %206 = shalt.err (!%p203_p6)
}
  0x46   :  { %s207_s10 = scalar_lea.hbm %s281_s2, 128 }
  0x47   :  { %p208_p7 = scmp.ne.s32.totalorder %s281_s2, %s207_s10  ;;  %p211_p8 = scmp.lt.u32.totalorder %s207_s10, %s281_s2 }
  0x49   :  { %p213_p9 = pnand %p211_p8, %p208_p7 }
  0x4b   :  { %216 = shalt.err (!%p213_p9)
}
  0x4c   :  { %126 = dma.vmem_to_hbm [thread:$0]  %s124_s6, 128, %s281_s2, [#allocation4]  }
  0x4d   :  { %221 = dma.done.wait [#allocation4], 128  }
  0x4e   :  { %222 = vsyncadd [#allocation4], 4294967168 }
  0x4f   :  { %130 = vsyncpa [#allocation3], 1 }
  0x50   :  { %131 = vsyncpa [#allocation6], 1 }
  0x51   :  { %132 = vsyncpa [#allocation4], 1 }

</bundles_post_ra>
